<compile_context>
chip_gen: v6e
topology: v6e:2x2x1
jax: 0.10.0
libtpu: 0.0.40
codegen_flags: <defaults>
</compile_context>

<pallas_src>
import jax
import jax.numpy as jnp
from jax.experimental import pallas as pl
from jax.experimental.pallas import tpu as pltpu

IN_FEATURES = 4
HIDDEN = 64
OUT_FEATURES = 2


def mlp_kernel(xt_ref, w1_ref, b1_ref, w2_ref, b2_ref, o_ref):
    # xt_ref: (4, TB)   batch on lanes
    # w1_ref: (64, 4)   b1_ref: (64, 1)
    # w2_ref: (2, 64)   b2_ref: (2, 1)
    # o_ref : (2, TB)
    xt = xt_ref[...]
    w1 = w1_ref[...]

    # Layer 1 (K=4): a 4-deep contraction would use <4% of the MXU, so do it as
    # 4 broadcast FMAs on the VPU over the already-loaded (64, TB) tile.
    h = w1[:, 0:1] * xt[0:1, :]
    for k in range(1, IN_FEATURES):                       # static, fully unrolled
        h = h + w1[:, k:k + 1] * xt[k:k + 1, :]
    h = jnp.tanh(h + b1_ref[...])                         # (64, TB), tanh on EUP

    # Layer 2 (K=64) on the MXU.
    out = jnp.dot(w2_ref[...], h, preferred_element_type=jnp.float32)
    o_ref[...] = (out + b2_ref[...]).astype(o_ref.dtype)  # (2, TB) lane-dense store


def network_forward(x, w1, b1, w2, b2, *, tb=512):
    """x: (B, 4) f32, weights in PyTorch layout (out, in) -> (B, 2) f32.

    Batch is padded to a multiple of the lane tile TB (>=128), computed in the
    transposed (features, batch) layout, then sliced / transposed back.
    """
    B = x.shape[0]
    # Lane tile: multiple of 128, capped at `tb`; sized well inside v7x's 64 MiB
    # VMEM ((4+64+2)*TB*4B*2 double-buffer ≈ 0.6 MiB at TB=512).
    TB = min(tb, pl.cdiv(B, 128) * 128)
    Bp = pl.cdiv(B, TB) * TB
    grid = (Bp // TB,)

    xt = jnp.pad(x.T, ((0, 0), (0, Bp - B)))              # (4, Bp), batch on lanes
    b1c = b1.reshape(HIDDEN, 1)
    b2c = b2.reshape(OUT_FEATURES, 1)

    out_t = pl.pallas_call(
        mlp_kernel,
        out_shape=jax.ShapeDtypeStruct((OUT_FEATURES, Bp), jnp.float32),
        grid=grid,
        in_specs=[
            pl.BlockSpec((IN_FEATURES, TB), lambda i: (0, i)),   # x tile per step
            pl.BlockSpec((HIDDEN, IN_FEATURES), lambda i: (0, 0)),   # resident
            pl.BlockSpec((HIDDEN, 1), lambda i: (0, 0)),             # resident
            pl.BlockSpec((OUT_FEATURES, HIDDEN), lambda i: (0, 0)),  # resident
            pl.BlockSpec((OUT_FEATURES, 1), lambda i: (0, 0)),       # resident
        ],
        out_specs=pl.BlockSpec((OUT_FEATURES, TB), lambda i: (0, i)),
        compiler_params=pltpu.CompilerParams(
            dimension_semantics=("parallel",),            # megacore split on v7x
        ),
    )(xt, w1, b1c, w2, b2c)

    return out_t[:, :B].T                                 # back to (B, 2)


def init_params(key):
    """PyTorch nn.Linear default init (uniform +/- 1/sqrt(fan_in)), PyTorch layout."""
    k1, k2, k3, k4 = jax.random.split(key, 4)
    bound1 = 1.0 / jnp.sqrt(IN_FEATURES)
    bound2 = 1.0 / jnp.sqrt(HIDDEN)
    w1 = jax.random.uniform(k1, (HIDDEN, IN_FEATURES), jnp.float32, -bound1, bound1)
    b1 = jax.random.uniform(k2, (HIDDEN,), jnp.float32, -bound1, bound1)
    w2 = jax.random.uniform(k3, (OUT_FEATURES, HIDDEN), jnp.float32, -bound2, bound2)
    b2 = jax.random.uniform(k4, (OUT_FEATURES,), jnp.float32, -bound2, bound2)
    return w1, b1, w2, b2


if __name__ == "__main__":
    key = jax.random.PRNGKey(0)
    k_params, k_x = jax.random.split(key)
    w1, b1, w2, b2 = init_params(k_params)

    B = 8  # small batch of 4-dim observations (CartPole-style)
    x = jax.random.normal(k_x, (B, IN_FEATURES), jnp.float32)

    q_values = network_forward(x, w1, b1, w2, b2)
    jax.block_until_ready(q_values)

    # Sanity check against plain-JAX reference of the same forward pass.
    ref = jnp.tanh(x @ w1.T + b1) @ w2.T + b2
    assert q_values.shape == (B, OUT_FEATURES)
    assert jnp.allclose(q_values, ref, atol=1e-5, rtol=1e-5)

    # Also exercise a larger, multi-tile batch (grid > 1, non-multiple of TB).
    B2 = 1337
    x2 = jax.random.normal(jax.random.PRNGKey(1), (B2, IN_FEATURES), jnp.float32)
    q2 = network_forward(x2, w1, b1, w2, b2)
    jax.block_until_ready(q2)
    ref2 = jnp.tanh(x2 @ w1.T + b1) @ w2.T + b2
    assert q2.shape == (B2, OUT_FEATURES)
    assert jnp.allclose(q2, ref2, atol=1e-5, rtol=1e-5)

    print("KERNEL_OK")
</pallas_src>

<mosaic_0001>
module attributes {stable_mosaic.version = 11 : i64} {
  func.func @mlp_kernel(%arg0: i32, %arg1: memref<4x128xf32, #tpu.memory_space<vmem>>, %arg2: memref<64x4xf32, #tpu.memory_space<vmem>>, %arg3: memref<64x1xf32, #tpu.memory_space<vmem>>, %arg4: memref<2x64xf32, #tpu.memory_space<vmem>>, %arg5: memref<2x1xf32, #tpu.memory_space<vmem>>, %arg6: memref<2x128xf32, #tpu.memory_space<vmem>>) attributes {dimension_semantics = [#tpu.dimension_semantics<parallel>], iteration_bounds = array<i64: 1>, scalar_prefetch = 0 : i64, scratch_operands = 0 : i64, tpu.core_type = #tpu.core_type<tc>, window_params = [{transform_indices = @transform_0, window_bounds = array<i64: 4, 128>}, {pipeline_mode = #tpu.pipeline_mode<synchronous>, transform_indices = @transform_1, window_bounds = array<i64: 64, 4>}, {pipeline_mode = #tpu.pipeline_mode<synchronous>, transform_indices = @transform_2, window_bounds = array<i64: 64, 1>}, {pipeline_mode = #tpu.pipeline_mode<synchronous>, transform_indices = @transform_3, window_bounds = array<i64: 2, 64>}, {pipeline_mode = #tpu.pipeline_mode<synchronous>, transform_indices = @transform_4, window_bounds = array<i64: 2, 1>}, {transform_indices = @transform_5, window_bounds = array<i64: 2, 128>}]} {
    %c0 = arith.constant 0 : index
    %c0_0 = arith.constant 0 : index
    %0 = vector.load %arg1[%c0, %c0_0] : memref<4x128xf32, #tpu.memory_space<vmem>>, vector<4x128xf32>
    %c0_1 = arith.constant 0 : index
    %c0_2 = arith.constant 0 : index
    %1 = vector.load %arg2[%c0_1, %c0_2] : memref<64x4xf32, #tpu.memory_space<vmem>>, vector<64x4xf32>
    %2 = vector.extract_strided_slice %1 {offsets = [0, 0], sizes = [64, 1], strides = [1, 1]} : vector<64x4xf32> to vector<64x1xf32>
    %3 = vector.extract_strided_slice %0 {offsets = [0, 0], sizes = [1, 128], strides = [1, 1]} : vector<4x128xf32> to vector<1x128xf32>
    %4 = vector.broadcast %2 : vector<64x1xf32> to vector<64x128xf32>
    %5 = vector.broadcast %3 : vector<1x128xf32> to vector<64x128xf32>
    %6 = arith.mulf %4, %5 : vector<64x128xf32>
    %7 = vector.extract_strided_slice %1 {offsets = [0, 1], sizes = [64, 1], strides = [1, 1]} : vector<64x4xf32> to vector<64x1xf32>
    %8 = vector.extract_strided_slice %0 {offsets = [1, 0], sizes = [1, 128], strides = [1, 1]} : vector<4x128xf32> to vector<1x128xf32>
    %9 = vector.broadcast %7 : vector<64x1xf32> to vector<64x128xf32>
    %10 = vector.broadcast %8 : vector<1x128xf32> to vector<64x128xf32>
    %11 = arith.mulf %9, %10 : vector<64x128xf32>
    %12 = arith.addf %6, %11 : vector<64x128xf32>
    %13 = vector.extract_strided_slice %1 {offsets = [0, 2], sizes = [64, 1], strides = [1, 1]} : vector<64x4xf32> to vector<64x1xf32>
    %14 = vector.extract_strided_slice %0 {offsets = [2, 0], sizes = [1, 128], strides = [1, 1]} : vector<4x128xf32> to vector<1x128xf32>
    %15 = vector.broadcast %13 : vector<64x1xf32> to vector<64x128xf32>
    %16 = vector.broadcast %14 : vector<1x128xf32> to vector<64x128xf32>
    %17 = arith.mulf %15, %16 : vector<64x128xf32>
    %18 = arith.addf %12, %17 : vector<64x128xf32>
    %19 = vector.extract_strided_slice %1 {offsets = [0, 3], sizes = [64, 1], strides = [1, 1]} : vector<64x4xf32> to vector<64x1xf32>
    %20 = vector.extract_strided_slice %0 {offsets = [3, 0], sizes = [1, 128], strides = [1, 1]} : vector<4x128xf32> to vector<1x128xf32>
    %21 = vector.broadcast %19 : vector<64x1xf32> to vector<64x128xf32>
    %22 = vector.broadcast %20 : vector<1x128xf32> to vector<64x128xf32>
    %23 = arith.mulf %21, %22 : vector<64x128xf32>
    %24 = arith.addf %18, %23 : vector<64x128xf32>
    %c0_3 = arith.constant 0 : index
    %c0_4 = arith.constant 0 : index
    %25 = vector.load %arg3[%c0_3, %c0_4] : memref<64x1xf32, #tpu.memory_space<vmem>>, vector<64x1xf32>
    %26 = vector.broadcast %25 : vector<64x1xf32> to vector<64x128xf32>
    %27 = arith.addf %24, %26 : vector<64x128xf32>
    %28 = math.tanh %27 : vector<64x128xf32>
    %c0_5 = arith.constant 0 : index
    %c0_6 = arith.constant 0 : index
    %29 = vector.load %arg4[%c0_5, %c0_6] : memref<2x64xf32, #tpu.memory_space<vmem>>, vector<2x64xf32>
    %cst = arith.constant dense<0.000000e+00> : vector<2x128xf32>
    %30 = tpu.matmul %29, %28, %cst {dimension_numbers = #tpu.dot_dimension_numbers<[1], [0], [0], [1], [0, 0, 1, 1], [], []>} : vector<2x64xf32>, vector<64x128xf32>, vector<2x128xf32> -> vector<2x128xf32>
    %c0_7 = arith.constant 0 : index
    %c0_8 = arith.constant 0 : index
    %31 = vector.load %arg5[%c0_7, %c0_8] : memref<2x1xf32, #tpu.memory_space<vmem>>, vector<2x1xf32>
    %32 = vector.broadcast %31 : vector<2x1xf32> to vector<2x128xf32>
    %33 = arith.addf %30, %32 : vector<2x128xf32>
    %c0_9 = arith.constant 0 : index
    %c0_10 = arith.constant 0 : index
    %34 = vector.load %arg6[%c0_9, %c0_10] : memref<2x128xf32, #tpu.memory_space<vmem>>, vector<2x128xf32>
    tpu.vector_store %arg6[%c0_9, %c0_10], %33 {strides = array<i32>} : memref<2x128xf32, #tpu.memory_space<vmem>>, vector<2x128xf32>,
    return
  }
  func.func @transform_0(%arg0: i32) -> (i32, i32) {
    %c0_i32 = arith.constant 0 : i32
    %c0_i32_0 = arith.constant 0 : i32
    return %c0_i32, %arg0 : i32, i32
  }
  func.func @transform_1(%arg0: i32) -> (i32, i32) {
    %c0_i32 = arith.constant 0 : i32
    %c0_i32_0 = arith.constant 0 : i32
    %c0_i32_1 = arith.constant 0 : i32
    return %c0_i32, %c0_i32_0 : i32, i32
  }
  func.func @transform_2(%arg0: i32) -> (i32, i32) {
    %c0_i32 = arith.constant 0 : i32
    %c0_i32_0 = arith.constant 0 : i32
    %c0_i32_1 = arith.constant 0 : i32
    return %c0_i32, %c0_i32_0 : i32, i32
  }
  func.func @transform_3(%arg0: i32) -> (i32, i32) {
    %c0_i32 = arith.constant 0 : i32
    %c0_i32_0 = arith.constant 0 : i32
    %c0_i32_1 = arith.constant 0 : i32
    return %c0_i32, %c0_i32_0 : i32, i32
  }
  func.func @transform_4(%arg0: i32) -> (i32, i32) {
    %c0_i32 = arith.constant 0 : i32
    %c0_i32_0 = arith.constant 0 : i32
    %c0_i32_1 = arith.constant 0 : i32
    return %c0_i32, %c0_i32_0 : i32, i32
  }
  func.func @transform_5(%arg0: i32) -> (i32, i32) {
    %c0_i32 = arith.constant 0 : i32
    %c0_i32_0 = arith.constant 0 : i32
    return %c0_i32, %arg0 : i32, i32
  }
}

</mosaic_0001>

<bundles_post_ra>
// kernel: tpu_custom_call.1
= control target key start
LH: loop header
LB: loop body
LE: loop exit
PB: predicated region body
PF: predicated region fallthrough
CT: control target
= control target key end

     0   :  { %v499_v2 = vmov 2   ;;  %v500_v3 = vmov 0   ;;  %v501_v5 = vmov 1   ;;  %s672_s0 = inlined_call_operand.vmem [shape: f32[4,128], index: 0, kind: input, shape index: {}]   ;;  %s673_s1 = inlined_call_operand.vmem [shape: f32[64,4], index: 1, kind: input, shape index: {}]   ;;  %s674_s2 = inlined_call_operand.vmem [shape: f32[64,1], index: 2, kind: input, shape index: {}]   ;;  %s675_s3 = inlined_call_operand.vmem [shape: f32[2,64], index: 3, kind: input, shape index: {}]   ;;  %s676_s4 = inlined_call_operand.vmem [shape: f32[2,1], index: 4, kind: input, shape index: {}]   ;;  %s677_s5 = inlined_call_operand.hbm [shape: f32[2,128], index: 5, kind: output, shape index: {}]  }
   0x1   :  { %v28_v0 = vld [vmem:[%s673_s1 + $0x30] sm:$0xff]  ;;  %v27_v1 = vld [vmem:[%s673_s1 + $0x28] sm:$0xff]  ;;  %441 = vset.pattern.permute.xlu0 %v499_v2  ;;  %434 = vset.pattern.permute.xlu1 %v500_v3  ;;  %v25_v4 = vld [vmem:[%s673_s1 + $0x18] sm:$0xff] }
   0x2   :  { %62 = vperm.xlu1 %434, %v28_v0   ;;  %155 = vperm.xlu0 %441, %v27_v1  }
   0x6   :  { %435 = vset.pattern.permute.xlu1 %v501_v5  ;;  %147 = vperm.xlu0 %441, %v25_v4  }
   0x7   :  { %10 = vsyncpa [#allocation3], 0  ;;  %107 = vperm.xlu1 %435, %v28_v0   ;;  %v29_v6 = vld [vmem:[%s673_s1 + $0x38] sm:$0xff]  ;;  %v502_v7 = vmov 3   ;;  %v26_v8 = vld [vmem:[%s673_s1 + $0x20] sm:$0xff]  ;;  %v503_v14 = vmov 0.0   ;;  %v70_v30 = vlaneseq }
   0x8   :  { %v22_v9 = vld [vmem:[%s673_s1] sm:$0xff]  ;;  %v245_v10 = vld [vmem:[%s674_s2 + $0x38] sm:$0xff]  ;;  %v23_v11 = vld [vmem:[%s673_s1 + $0x8] sm:$0xff]  ;;  %408 = vmatprep.subr.mxu0 %v503_v14  ;;  %vm504_vm0 = vmmov 0   ;;  %vm309_vm1 = vcmask 523264   ;;  %s505_s27 = smov [#allocation2]  }
   0x9   :  { %v242_v12 = vld [vmem:[%s674_s2 + $0x20] sm:$0xff]  ;;  %v241_v13 = vld [vmem:[%s674_s2 + $0x18] sm:$0xff]  ;;  %v24_v15 = vld [vmem:[%s673_s1 + $0x10] sm:$0xff]  ;;  %424 = vmatprep.mubr.msk.f32.mxu0 %vm504_vm0, %v503_v14  ;;  %v71_v33 = vshrl.u32 %v70_v30, 7  ;;  %s390_s28 = sshll.u32 %s505_s27, 4  ;;  %s391_s28 = int_to_ptr.vmem [resolvable:$true] %s390_s28 }
   0xa   :  { %448 = vset.pattern.permute.xlu0 %v502_v7  ;;  %v240_v16 = vld [vmem:[%s674_s2 + $0x10] sm:$0xff]  ;;  %v238_v17 = vld [vmem:[%s674_s2] sm:$0xff]  ;;  %v243_v19 = vld [vmem:[%s674_s2 + $0x28] sm:$0xff]  ;;  %s477_s29 = scalar_lea.vmem %s391_s28, 32  ;;  %p482_p1 = scmp.lt.s32.totalorder %s391_s28, %s391_s28 }
   0xb   :  { %436 = vset.pattern.permute.xlu1 %v499_v2  ;;  %215 = vperm.xlu0 %448, %v29_v6   ;;  %v244_v18 = vld [vmem:[%s674_s2 + $0x30] sm:$0xff]  ;;  %v239_v20 = vld [vmem:[%s674_s2 + $0x8] sm:$0xff]  ;;  %v303_v21 = vld [vmem:[%s676_s4] sm:$0x3]  ;;  %v116_v35 = vsub.s32 1, %v71_v33  ;;  %v72_v37 = vsub.s32 0, %v71_v33  ;;  %p478_p0 = scmp.ne.s32.totalorder %s391_s28, %s477_s29  ;;  %p483_p2 = scmp.lt.s32.totalorder %s477_s29, %s477_s29 }
   0xc   :  { %163 = vperm.xlu1 %436, %v29_v6   ;;  %v168_v38 = vsub.s32 2, %v71_v33  ;;  %v220_v39 = vsub.s32 3, %v71_v33  ;;  %v21_v41 = vld [vmem:[%s672_s0] sm:$0xf] }
   0xd   :  { %v617_v42 = vrot.slane %v21_v41, %v116_v35  ;;  %v619_v43 = vrot.slane %v21_v41, %v72_v37  ;;  %p484_p3 = por %p483_p2, %p482_p1 }
   0xe   :  { %v621_v44 = vrot.slane %v21_v41, %v168_v38  ;;  %v623_v45 = vrot.slane %v21_v41, %v220_v39 }
   0xf   :  { %199 = vperm.xlu0 %448, %v25_v4   ;;  %p485_p4 = pnand %p484_p3, %p478_p0 }
  0x10   :  { %437 = vset.pattern.permute.xlu1 %v501_v5 }
  0x11   :  { %103 = vperm.xlu1 %437, %v27_v1  }
  0x13   :  { %453 = vset.pattern.permute.xlu0 %v501_v5 }
  0x14   :  { %111 = vperm.xlu0 %453, %v29_v6  }
  0x15   :  { %438 = vset.pattern.permute.xlu1 %v499_v2 }
  0x16   :  { %159 = vperm.xlu1 %438, %v28_v0  }
  0x18   :  { %95 = vperm.xlu0 %453, %v25_v4  }
  0x1a   :  { %439 = vset.pattern.permute.xlu1 %v500_v3 }
  0x1b   :  { %52 = vperm.xlu1 %439, %v26_v8  }
  0x1c   :  { %83 = vperm.xlu0 %453, %v22_v9  }
  0x1f   :  { %440 = vset.pattern.permute.xlu1 %v501_v5 }
  0x20   :  { %99 = vperm.xlu1 %440, %v26_v8   ;;  %455 = vset.pattern.permute.xlu0 %v500_v3 }
  0x21   :  { %67 = vperm.xlu0 %455, %v29_v6  }
  0x24   :  { %442 = vset.pattern.permute.xlu1 %v502_v7 }
  0x25   :  { %211 = vperm.xlu1 %442, %v28_v0   ;;  %57 = vperm.xlu0 %455, %v27_v1  }
  0x29   :  { %443 = vset.pattern.permute.xlu1 %v500_v3  ;;  %283 = vperm.xlu0 %455, %v245_v10  }
  0x2a   :  { %47 = vperm.xlu1 %443, %v25_v4  }
  0x2d   :  { %37 = vperm.xlu0 %455, %v23_v11  }
  0x2e   :  { %444 = vset.pattern.permute.xlu1 %v499_v2 }
  0x2f   :  { %151 = vperm.xlu1 %444, %v26_v8  }
  0x31   :  { %268 = vperm.xlu0 %455, %v242_v12  }
  0x33   :  { %445 = vset.pattern.permute.xlu1 %v502_v7 }
  0x34   :  { %207 = vperm.xlu1 %445, %v27_v1  }
  0x35   :  { %263 = vperm.xlu0 %455, %v241_v13  }
  0x38   :  { %446 = vset.pattern.permute.xlu1 %v500_v3 }
  0x39   :  { %42 = vperm.xlu1 %446, %v24_v15   ;;  %258 = vperm.xlu0 %455, %v240_v16  }
  0x3d   :  { %447 = vset.pattern.permute.xlu1 %v501_v5  ;;  %248 = vperm.xlu0 %455, %v238_v17  }
  0x3e   :  { %91 = vperm.xlu1 %447, %v24_v15  }
  0x42   :  { %449 = vset.pattern.permute.xlu1 %v502_v7 }
  0x43   :  { %203 = vperm.xlu1 %449, %v26_v8  }
  0x47   :  { %450 = vset.pattern.permute.xlu1 %v500_v3 }
  0x48   :  { %278 = vperm.xlu1 %450, %v244_v18  }
  0x4c   :  { %451 = vset.pattern.permute.xlu1 %v501_v5 }
  0x4d   :  { %87 = vperm.xlu1 %451, %v23_v11  }
  0x51   :  { %452 = vset.pattern.permute.xlu1 %v499_v2 }
  0x52   :  { %143 = vperm.xlu1 %452, %v24_v15  }
  0x56   :  { %454 = vset.pattern.permute.xlu1 %v500_v3 }
  0x57   :  { %273 = vperm.xlu1 %454, %v243_v19  }
  0x5b   :  { %32 = vperm.xlu1 %454, %v22_v9  }
  0x5f   :  { %456 = vset.pattern.permute.xlu1 %v499_v2 }
  0x60   :  { %139 = vperm.xlu1 %456, %v23_v11  }
  0x64   :  { %457 = vset.pattern.permute.xlu1 %v502_v7 }
  0x65   :  { %195 = vperm.xlu1 %457, %v24_v15  }
  0x69   :  { %458 = vset.pattern.permute.xlu1 %v499_v2 }
  0x6a   :  { %135 = vperm.xlu1 %458, %v22_v9  }
  0x6e   :  { %459 = vset.pattern.permute.xlu1 %v502_v7 }
  0x6f   :  { %191 = vperm.xlu1 %459, %v23_v11  }
  0x73   :  { %187 = vperm.xlu1 %459, %v22_v9  }
  0x77   :  { %460 = vset.pattern.permute.xlu1 %v500_v3 }
  0x78   :  { %253 = vperm.xlu1 %460, %v239_v20  }
  0x7c   :  { %306 = vperm.xlu1 %460, %v303_v21  }
  0x7d   :  { %v63_v22 = vpop.permute.xlu1 %62  ;;  %v609_v23 = vpop.permute.xlu0 %155 }
  0x7e   :  { %v80_v9 = vmul.f32 %v619_v43, %v63_v22 }
  0x81   :  { %v148_v24 = vpop.permute.xlu0 %147 }
  0x82   :  { %v108_v25 = vpop.permute.xlu1 %107  ;;  %v173_v61 = vmul.f32 %v621_v44, %v148_v24 }
  0x83   :  { %v124_v8 = vmul.f32 %v617_v42, %v108_v25 }
  0x85   :  { %v132_v11 = vadd.f32 %v124_v8, %v80_v9 }
  0x86   :  { %v216_v26 = vpop.permute.xlu0 %215 }
  0x87   :  { %v164_v27 = vpop.permute.xlu1 %163  ;;  %v229_v51 = vmul.f32 %v623_v45, %v216_v26 }
  0x88   :  { %v177_v50 = vmul.f32 %v621_v44, %v164_v27  ;;  %v175_v27 = vmul.f32 %v621_v44, %v609_v23 }
  0x8a   :  { %v200_v28 = vpop.permute.xlu0 %199 }
  0x8b   :  { %v225_v63 = vmul.f32 %v623_v45, %v200_v28 }
  0x8c   :  { %v104_v29 = vpop.permute.xlu1 %103 }
  0x8d   :  { %v123_v25 = vmul.f32 %v617_v42, %v104_v29 }
  0x8f   :  { %v112_v31 = vpop.permute.xlu0 %111 }
  0x90   :  { %v125_v46 = vmul.f32 %v617_v42, %v112_v31 }
  0x91   :  { %v160_v32 = vpop.permute.xlu1 %159 }
  0x92   :  { %v176_v10 = vmul.f32 %v621_v44, %v160_v32 }
  0x93   :  { %v96_v34 = vpop.permute.xlu0 %95 }
  0x94   :  { %v121_v57 = vmul.f32 %v617_v42, %v96_v34  ;;  %v184_v15 = vadd.f32 %v176_v10, %v132_v11 }
  0x96   :  { %v53_v36 = vpop.permute.xlu1 %52 }
  0x97   :  { %v612_v40 = vpop.permute.xlu0 %83  ;;  %v78_v22 = vmul.f32 %v619_v43, %v53_v36 }
  0x9b   :  { %v100_v47 = vpop.permute.xlu1 %99 }
  0x9c   :  { %v68_v48 = vpop.permute.xlu0 %67  ;;  %v122_v20 = vmul.f32 %v617_v42, %v100_v47 }
  0x9d   :  { %v81_v49 = vmul.f32 %v619_v43, %v68_v48 }
  0x9e   :  { %v130_v28 = vadd.f32 %v122_v20, %v78_v22 }
  0x9f   :  { %v133_v52 = vadd.f32 %v125_v46, %v81_v49 }
  0xa0   :  { %v212_v53 = vpop.permute.xlu1 %211  ;;  %v58_v54 = vpop.permute.xlu0 %57 }
  0xa1   :  { %v185_v55 = vadd.f32 %v177_v50, %v133_v52  ;;  %v228_v12 = vmul.f32 %v623_v45, %v212_v53  ;;  %v79_v21 = vmul.f32 %v619_v43, %v58_v54 }
  0xa3   :  { %v237_v56 = vadd.f32 %v229_v51, %v185_v55  ;;  %v236_v16 = vadd.f32 %v228_v12, %v184_v15  ;;  %v131_v30 = vadd.f32 %v123_v25, %v79_v21 }
  0xa4   :  { %v284_v58 = vpop.permute.xlu0 %283 }
  0xa5   :  { %v293_v59 = vadd.f32 %v284_v58, %v237_v56  ;;  %v48_v60 = vpop.permute.xlu1 %47  ;;  %v183_v38 = vadd.f32 %v175_v27, %v131_v30 }
  0xa6   :  { %v77_v62 = vmul.f32 %v619_v43, %v48_v60 }
  0xa7   :  { %461 = vtanh.f32 %v293_v59 }
  0xa8   :  { %v129_v0 = vadd.f32 %v121_v57, %v77_v62  ;;  %v38_v19 = vpop.permute.xlu0 %37 }
  0xaa   :  { %v152_v1 = vpop.permute.xlu1 %151  ;;  %v181_v2 = vadd.f32 %v173_v61, %v129_v0 }
  0xab   :  { %v174_v26 = vmul.f32 %v621_v44, %v152_v1  ;;  %v75_v1 = vmul.f32 %v619_v43, %v38_v19 }
  0xac   :  { %v233_v3 = vadd.f32 %v225_v63, %v181_v2  ;;  %v269_v32 = vpop.permute.xlu0 %268 }
  0xad   :  { %v182_v33 = vadd.f32 %v174_v26, %v130_v28 }
  0xaf   :  { %v208_v4 = vpop.permute.xlu1 %207 }
  0xb0   :  { %v227_v34 = vmul.f32 %v623_v45, %v208_v4  ;;  %v264_v29 = vpop.permute.xlu0 %263  ;;  %v118_v4 = vmul.f32 %v617_v42, %v612_v40 }
  0xb1   :  { %v289_v48 = vadd.f32 %v264_v29, %v233_v3 }
  0xb2   :  { %v235_v39 = vadd.f32 %v227_v34, %v183_v38 }
  0xb4   :  { %v462_v5 = vpop.eup %461  ;;  %v43_v6 = vpop.permute.xlu1 %42 }
  0xb5   :  { %409 = vmatpush3.msra.mxu0 %v462_v5  ;;  %v76_v51 = vmul.f32 %v619_v43, %v43_v6  ;;  %v259_v60 = vpop.permute.xlu0 %258 }
  0xb6   :  { %410 = vmatprep.subr.mxu0 %v503_v14 }
  0xb9   :  { %v92_v7 = vpop.permute.xlu1 %91 }
  0xba   :  { %v120_v49 = vmul.f32 %v617_v42, %v92_v7 }
  0xbc   :  { %v128_v53 = vadd.f32 %v120_v49, %v76_v51 }
  0xbe   :  { %v204_v13 = vpop.permute.xlu1 %203 }
  0xbf   :  { %v226_v31 = vmul.f32 %v623_v45, %v204_v13 }
  0xc1   :  { %v234_v37 = vadd.f32 %v226_v31, %v182_v33 }
  0xc3   :  { %v279_v17 = vpop.permute.xlu1 %278  ;;  %v290_v46 = vadd.f32 %v269_v32, %v234_v37 }
  0xc4   :  { %v292_v18 = vadd.f32 %v279_v17, %v236_v16  ;;  %v249_v16 = vpop.permute.xlu0 %248 }
  0xc6   :  { %463 = vtanh.f32 %v292_v18 }
  0xc8   :  { %v88_v24 = vpop.permute.xlu1 %87 }
  0xc9   :  { %v119_v2 = vmul.f32 %v617_v42, %v88_v24 }
  0xcb   :  { %v127_v8 = vadd.f32 %v119_v2, %v75_v1 }
  0xcd   :  { %v144_v35 = vpop.permute.xlu1 %143 }
  0xce   :  { %v172_v52 = vmul.f32 %v621_v44, %v144_v35 }
  0xd0   :  { %v180_v55 = vadd.f32 %v172_v52, %v128_v53 }
  0xd2   :  { %v274_v41 = vpop.permute.xlu1 %273 }
  0xd3   :  { %v464_v36 = vpop.eup %463  ;;  %v291_v47 = vadd.f32 %v274_v41, %v235_v39 }
  0xd4   :  { %411 = vmatpush3.msra.mxu0 %v464_v36 }
  0xd5   :  { %465 = vtanh.f32 %v291_v47  ;;  %412 = vmatprep.subr.mxu0 %v503_v14 }
  0xd6   :  { %v33_v23 = vpop.permute.xlu1 %32  ;;  %467 = vtanh.f32 %v290_v46 }
  0xd7   :  { %469 = vtanh.f32 %v289_v48  ;;  %v74_v0 = vmul.f32 %v619_v43, %v33_v23 }
  0xd9   :  { %v126_v7 = vadd.f32 %v118_v4, %v74_v0 }
  0xdb   :  { %v140_v50 = vpop.permute.xlu1 %139 }
  0xdc   :  { %v171_v6 = vmul.f32 %v621_v44, %v140_v50 }
  0xde   :  { %v179_v13 = vadd.f32 %v171_v6, %v127_v8 }
  0xe0   :  { %v196_v54 = vpop.permute.xlu1 %195 }
  0xe1   :  { %v224_v56 = vmul.f32 %v623_v45, %v196_v54 }
  0xe2   :  { %v466_v57 = vpop.eup %465 }
  0xe3   :  { %v232_v58 = vadd.f32 %v224_v56, %v180_v55  ;;  %413 = vmatpush3.msra.mxu0 %v466_v57  ;;  %v468_v59 = vpop.eup %467 }
  0xe4   :  { %414 = vmatprep.subr.mxu0 %v503_v14  ;;  %v470_v63 = vpop.eup %469 }
  0xe5   :  { %v288_v61 = vadd.f32 %v259_v60, %v232_v58  ;;  %v136_v62 = vpop.permute.xlu1 %135  ;;  %415 = vmatpush3.msra.mxu0 %v468_v59 }
  0xe6   :  { %416 = vmatprep.subr.mxu0 %v503_v14  ;;  %v170_v5 = vmul.f32 %v621_v44, %v136_v62  ;;  %v302_v44 = vld [vmem:[%s675_s3] sm:$0x3] }
  0xe7   :  { %471 = vtanh.f32 %v288_v61  ;;  %417 = vmatpush3.msra.mxu0 %v470_v63 }
  0xe8   :  { %418 = vmatprep.subr.mxu0 %v503_v14  ;;  %v178_v11 = vadd.f32 %v170_v5, %v126_v7 }
  0xea   :  { %v192_v3 = vpop.permute.xlu1 %191 }
  0xeb   :  { %v223_v9 = vmul.f32 %v623_v45, %v192_v3 }
  0xed   :  { %v231_v15 = vadd.f32 %v223_v9, %v179_v13 }
  0xee   :  { %v188_v10 = vpop.permute.xlu1 %187 }
  0xef   :  { %v222_v12 = vmul.f32 %v623_v45, %v188_v10 }
  0xf1   :  { %v230_v43 = vadd.f32 %v222_v12, %v178_v11 }
  0xf3   :  { %v254_v17 = vpop.permute.xlu1 %253  ;;  %v286_v19 = vadd.f32 %v249_v16, %v230_v43 }
  0xf4   :  { %v472_v18 = vpop.eup %471  ;;  %v287_v40 = vadd.f32 %v254_v17, %v231_v15 }
  0xf5   :  { %419 = vmatpush3.msra.mxu0 %v472_v18 }
  0xf6   :  { %473 = vtanh.f32 %v287_v40  ;;  %420 = vmatprep.subr.mxu0 %v503_v14 }
  0xf7   :  { %475 = vtanh.f32 %v286_v19  ;;  %v307_v20 = vpop.permute.xlu1 %306 }
 0x103   :  { %v474_v42 = vpop.eup %473 }
 0x104   :  { %421 = vmatpush3.msra.mxu0 %v474_v42  ;;  %v476_v45 = vpop.eup %475 }
 0x105   :  { %422 = vmatprep.subr.mxu0 %v503_v14 }
 0x106   :  { %423 = vmatpush3.msra.mxu0 %v476_v45 }
 0x107   :  { %425 = vmatmul.mubr.msk.f32.vlgmr.msra.gmra.mxu0 %vm309_vm1, %v302_v44 }
 0x1c7   :  { %v379_v21 = vpop.f32.mrf.mxu0 }
 0x1c8   :  { %v380_v24 = vadd.f32 %v379_v21, %v307_v20 }
 0x1c9   :  { %v426_v25 = vpop.f32.mrf.mxu0 }
 0x1ca   :  { %383 = vst [vmem:[#allocation2] sm:$0x3] %v380_v24 }
 0x1cb   :  { %488 = shalt.err (!%p485_p4)
}
 0x1cc   :  { %393 = dma.vmem_to_hbm [thread:$0]  %s391_s28, 32, %s677_s5, [#allocation3]  }
 0x1cd   :  { %497 = dma.done.wait [#allocation3], 32  }
 0x1ce   :  { %498 = vsyncadd [#allocation3], 4294967264 }
 0x1cf   :  { %397 = vsyncpa [#allocation3], 1 }

</bundles_post_ra>
